<compile_context>
chip_gen: v7x
topology: tpu7x:2x2x1
jax: 0.10.0
libtpu: 0.0.40
codegen_flags: <defaults>
</compile_context>

<pallas_src>
import jax
import jax.numpy as jnp
from jax import lax
from jax.experimental import pallas as pl
from jax.experimental.pallas import tpu as pltpu


# ----------------------------- Pallas kernels ------------------------------

def _lo_simple_kernel(x_ref, w_ref, b_ref, out_ref, acc_ref):
    # x_ref  : (TILE_N, TILE_K) input slab (any float dtype; upcast in-reg)
    # w_ref  : (1, TILE_K) bf16 effective weights, streamed along K
    # b_ref  : (1, 1) f32 effective bias (the mu term)
    # out_ref: (TILE_N, 1) f32 detection statistic
    # acc_ref: (TILE_N, 1) f32 K-axis accumulator
    k = pl.program_id(1)

    @pl.when(k == 0)
    def _init():
        acc_ref[...] = jnp.zeros_like(acc_ref)

    # v5e's VPU has no bf16 ALU: upcast both operands in-register before mul.
    x = x_ref[...].astype(jnp.float32)
    w = w_ref[...].astype(jnp.float32)
    acc_ref[...] += jnp.sum(x * w, axis=-1, keepdims=True)

    @pl.when(k == pl.num_programs(1) - 1)
    def _finalize():
        out_ref[...] = acc_ref[...] - b_ref[...]


def _lo_composite_kernel(x_ref, w_ref, b_ref, out_ref, acc_ref):
    # x_ref  : (TILE_N, TILE_K);  w_ref: (C, TILE_K) bf16, lane-dense
    # b_ref  : (1, C) f32;  out_ref: (TILE_N, 1);  acc_ref: (TILE_N, C) f32
    k = pl.program_id(1)

    @pl.when(k == 0)
    def _init():
        acc_ref[...] = jnp.zeros_like(acc_ref)

    x = x_ref[...].astype(jnp.bfloat16)          # MXU takes bf16 natively
    # Contract the last (K) axis of both -> (TILE_N, C), f32 accumulation.
    acc_ref[...] += lax.dot_general(
        x, w_ref[...],
        dimension_numbers=(((1,), (1,)), ((), ())),
        preferred_element_type=jnp.float32)

    @pl.when(k == pl.num_programs(1) - 1)
    def _finalize():
        out_ref[...] = jnp.max(acc_ref[...] - b_ref[...], axis=-1,
                               keepdims=True)


# ------------------------------- wrapper -----------------------------------

def _round_up(a, m):
    return (a + m - 1) // m * m


def _vmem_budget_bytes():
    """Generation-aware usable-VMEM budget (also used as vmem_limit_bytes)."""
    try:
        cap = int(pltpu.get_tpu_info().vmem_capacity_bytes)
    except Exception:
        cap = 64 << 20                       # conservative: v7x per-core VMEM
    return max(16 << 20, min(cap * 3 // 4, cap - (16 << 20)))


def _select_tiles(n, k3, x_bytes, w_rows_padded, vmem_budget):
    """TILE_N: <=256 rows; >=2 batch tiles whenever n>8 (v7x megacore).
    TILE_K: multiple-of-128 divisor of K3, sized so the double-buffered x and
    weight streams use <= half the VMEM budget (8 MiB per-x-block cap)."""
    if n <= 8:
        tile_n = max(n, 1)                    # full batch dim (always legal)
    else:
        tile_n = min(256, _round_up(-(-n // 2), 8))

    bytes_per_k = 2 * (tile_n * x_bytes + w_rows_padded * 2)   # double-buffered
    tile_k = min(k3,
                 (vmem_budget // 2) // max(1, bytes_per_k),
                 (8 << 20) // max(1, tile_n * x_bytes))
    tile_k = (tile_k // 128) * 128
    while tile_k >= 128 and k3 % tile_k:
        tile_k -= 128
    if tile_k < 128:
        tile_k = k3            # no 128-aligned divisor: stream K in one piece
    return tile_n, tile_k


def lo_first_order_forward(x_nchw, mean_perturbations, mu, inv_var,
                           patch_size, detector_type='simple'):
    N, C_img, H, W = x_nchw.shape
    assert C_img == 3, "luminance preprocess assumes RGB input"
    ph, pw = patch_size
    npy, npx = H // ph, W // pw
    num_patches = npy * npx
    HW = H * W
    K3 = C_img * HW
    num_classes = mean_perturbations.shape[0]

    # ---- offline parameter folding (constants at inference time, f32) ----
    def unpatch(a):
        # (..., num_patches, P) -> (..., H*W), matching x_lum.reshape(-1, H*W)
        lead = a.shape[:-2]
        nl = len(lead)
        a = a.reshape(lead + (npy, npx, ph, pw))
        a = a.transpose(tuple(range(nl)) + (nl, nl + 2, nl + 1, nl + 3))
        return a.reshape(lead + (HW,))

    mp = mean_perturbations.astype(jnp.float32)
    iv = inv_var.astype(jnp.float32)
    mu32 = mu.astype(jnp.float32)

    # target_scores[n, c] = sum_hw A[c, hw] * x_lum[n, hw] - beta[c]
    A = unpatch(mp * iv[None]) / float(num_patches)             # (C, HW)
    beta = A @ unpatch(mu32)                                    # (C,)

    # Fold BT.601 luminance so the kernel consumes the raw NCHW view:
    # x_lum[n, hw] = sum_ch lum_w[ch] * x[n, ch*HW + hw]
    lum_w = jnp.array([0.299, 0.587, 0.114], dtype=jnp.float32)
    W_eff = (lum_w[None, :, None] * A[:, None, :]).reshape(num_classes, K3)

    if detector_type == 'simple':
        # mean over classes commutes with the linear score -> single GEMV
        w = W_eff.mean(axis=0).reshape(1, K3).astype(jnp.bfloat16)  # (1, K3)
        b = beta.mean().reshape(1, 1)                               # (1, 1) f32
        kernel = _lo_simple_kernel
        w_rows, cc = 1, 1
    elif detector_type == 'composite':
        w = W_eff.astype(jnp.bfloat16)                # (C, K3), lane-dense
        b = beta.reshape(1, num_classes)              # (1, C) f32
        kernel = _lo_composite_kernel
        w_rows, cc = num_classes, num_classes
    else:
        raise ValueError(f"unknown detector type: {detector_type}")

    # ---- activation: pure view of NCHW; no pad, no cast (streamed as-is) ----
    x_flat = x_nchw.reshape(N, K3)
    x_bytes = x_flat.dtype.itemsize
    budget = _vmem_budget_bytes()
    tile_n, tile_k = _select_tiles(N, K3, x_bytes, _round_up(w_rows, 8), budget)
    grid = (pl.cdiv(N, tile_n), K3 // tile_k)

    cost = pl.CostEstimate(
        flops=2 * N * K3 * cc + 3 * N * cc,
        transcendentals=0,
        bytes_accessed=int(N * K3 * x_bytes + grid[0] * w_rows * K3 * 2
                           + 4 * (cc + N)))

    out = pl.pallas_call(
        kernel,
        out_shape=jax.ShapeDtypeStruct((N, 1), jnp.float32),
        grid=grid,
        in_specs=[
            pl.BlockSpec((tile_n, tile_k), lambda i, k: (i, k)),   # x: streamed
            pl.BlockSpec((w_rows, tile_k), lambda i, k: (0, k)),   # w: streamed
            pl.BlockSpec((1, cc), lambda i, k: (0, 0)),            # bias: resident
        ],
        out_specs=pl.BlockSpec((tile_n, 1), lambda i, k: (i, 0)),
        scratch_shapes=[pltpu.VMEM((tile_n, cc), jnp.float32)],    # K accumulator
        compiler_params=pltpu.CompilerParams(
            dimension_semantics=("parallel", "arbitrary"),
            vmem_limit_bytes=int(budget)),
        cost_estimate=cost,
    )(x_flat, w, b)
    return out[:, 0]


# --------------------------- pure-JAX reference -----------------------------

def _reference(x_nchw, mean_perturbations, mu, inv_var, patch_size,
               detector_type='simple'):
    # Direct, op-for-op transcription of the PyTorch forward (for validation).
    N, _, H, W = x_nchw.shape
    ph, pw = patch_size
    num_patches = (H // ph) * (W // pw)
    P = ph * pw
    lum_w = jnp.array([0.299, 0.587, 0.114], dtype=x_nchw.dtype)
    x_lum = jnp.einsum('nchw,c->nhw', x_nchw, lum_w)
    xp = x_lum.reshape(N, H // ph, ph, W // pw, pw)
    xp = xp.transpose(0, 1, 3, 2, 4).reshape(N, num_patches, P)
    score = -(xp - mu[None]) * inv_var[None]
    first_order = -jnp.einsum('cpd,npd->ncp', mean_perturbations, score)
    target_scores = first_order.mean(axis=-1)            # mean over patches
    if detector_type == 'simple':
        return target_scores.mean(axis=-1)                # mean over classes
    return target_scores.max(axis=-1)                     # composite


if __name__ == "__main__":
    key = jax.random.PRNGKey(0)
    k_x, k_mp, k_mu = jax.random.split(key, 3)

    N, C_img, H, W = 2, 3, 16, 16
    patch_size = (4, 4)
    num_classes = 4
    num_patches = (H // patch_size[0]) * (W // patch_size[1])
    P = patch_size[0] * patch_size[1]

    x32 = jax.random.uniform(k_x, (N, C_img, H, W), dtype=jnp.float32)
    # nn.Parameter(torch.randn(num_classes, num_patches, P)) -> deterministic init
    mean_perturbations = jax.random.normal(
        k_mp, (num_classes, num_patches, P), dtype=jnp.float32)
    # Score_Gaussian parameters (deterministic)
    mu = jax.random.normal(k_mu, (num_patches, P), dtype=jnp.float32) * 0.1
    inv_var = jnp.full((num_patches, P), 2.0, dtype=jnp.float32)

    for dt in ("simple", "composite"):
        ref = _reference(x32, mean_perturbations, mu, inv_var, patch_size, dt)
        # exercise both the recommended bf16 streaming path and the f32 path
        for x in (x32.astype(jnp.bfloat16), x32):
            out = lo_first_order_forward(x, mean_perturbations, mu, inv_var,
                                         patch_size, detector_type=dt)
            out = jax.block_until_ready(out)
            assert out.shape == (N,)
            # tolerance loosened vs the f32 reference for bf16 streaming/weights
            assert jnp.allclose(out, ref, atol=5e-2, rtol=5e-2), \
                (dt, str(x.dtype), out, ref)
    print("KERNEL_OK")
</pallas_src>

<mosaic_0001>
module attributes {stable_mosaic.version = 11 : i64} {
  func.func @_lo_simple_kernel(%arg0: i32, %arg1: i32, %arg2: memref<2x768xbf16, #tpu.memory_space<vmem>>, %arg3: memref<1x768xbf16, #tpu.memory_space<vmem>>, %arg4: memref<1x1xf32, #tpu.memory_space<vmem>>, %arg5: memref<2x1xf32, #tpu.memory_space<vmem>>, %arg6: memref<2x1xf32, #tpu.memory_space<vmem>>) attributes {dimension_semantics = [#tpu.dimension_semantics<parallel>, #tpu.dimension_semantics<arbitrary>], iteration_bounds = array<i64: 1, 1>, scalar_prefetch = 0 : i64, scratch_operands = 1 : i64, tpu.core_type = #tpu.core_type<tc>, window_params = [{transform_indices = @transform_0, window_bounds = array<i64: 2, 768>}, {transform_indices = @transform_1, window_bounds = array<i64: 1, 768>}, {pipeline_mode = #tpu.pipeline_mode<synchronous>, transform_indices = @transform_2, window_bounds = array<i64: 1, 1>}, {transform_indices = @transform_3, window_bounds = array<i64: 2, 1>}]} {
    %c0_i32 = arith.constant 0 : i32
    %0 = arith.cmpi eq, %arg1, %c0_i32 : i32
    %1 = arith.extui %0 : i1 to i32
    %c0_i32_0 = arith.constant 0 : i32
    %2 = arith.cmpi ne, %1, %c0_i32_0 : i32
    scf.if %2 {
      %cst_10 = arith.constant 0.000000e+00 : f32
      %17 = vector.broadcast %cst_10 : f32 to vector<2x1xf32>
      %c0_11 = arith.constant 0 : index
      %c0_12 = arith.constant 0 : index
      %18 = vector.load %arg6[%c0_11, %c0_12] : memref<2x1xf32, #tpu.memory_space<vmem>>, vector<2x1xf32>
      tpu.vector_store %arg6[%c0_11, %c0_12], %17 {strides = array<i32>} : memref<2x1xf32, #tpu.memory_space<vmem>>, vector<2x1xf32>,
    } else {
    }
    %c0 = arith.constant 0 : index
    %c0_1 = arith.constant 0 : index
    %3 = vector.load %arg2[%c0, %c0_1] : memref<2x768xbf16, #tpu.memory_space<vmem>>, vector<2x768xbf16>
    %4 = arith.extf %3 : vector<2x768xbf16> to vector<2x768xf32>
    %c0_2 = arith.constant 0 : index
    %c0_3 = arith.constant 0 : index
    %5 = vector.load %arg3[%c0_2, %c0_3] : memref<1x768xbf16, #tpu.memory_space<vmem>>, vector<1x768xbf16>
    %6 = arith.extf %5 : vector<1x768xbf16> to vector<1x768xf32>
    %c0_4 = arith.constant 0 : index
    %c0_5 = arith.constant 0 : index
    %7 = vector.load %arg6[%c0_4, %c0_5] : memref<2x1xf32, #tpu.memory_space<vmem>>, vector<2x1xf32>
    %8 = vector.broadcast %6 : vector<1x768xf32> to vector<2x768xf32>
    %9 = arith.mulf %4, %8 : vector<2x768xf32>
    %cst = arith.constant dense<0.000000e+00> : vector<2xf32>
    %10 = vector.multi_reduction <add>, %9, %cst [1] : vector<2x768xf32> to vector<2xf32>
    %11 = vector.shape_cast %10 : vector<2xf32> to vector<2x1xf32>
    %12 = arith.addf %7, %11 : vector<2x1xf32>
    %c0_6 = arith.constant 0 : index
    %c0_7 = arith.constant 0 : index
    %13 = vector.load %arg6[%c0_6, %c0_7] : memref<2x1xf32, #tpu.memory_space<vmem>>, vector<2x1xf32>
    tpu.vector_store %arg6[%c0_6, %c0_7], %12 {strides = array<i32>} : memref<2x1xf32, #tpu.memory_space<vmem>>, vector<2x1xf32>,
    %c0_i32_8 = arith.constant 0 : i32
    %14 = arith.cmpi eq, %arg1, %c0_i32_8 : i32
    %15 = arith.extui %14 : i1 to i32
    %c0_i32_9 = arith.constant 0 : i32
    %16 = arith.cmpi ne, %15, %c0_i32_9 : i32
    scf.if %16 {
      %c0_10 = arith.constant 0 : index
      %c0_11 = arith.constant 0 : index
      %17 = vector.load %arg6[%c0_10, %c0_11] : memref<2x1xf32, #tpu.memory_space<vmem>>, vector<2x1xf32>
      %c0_12 = arith.constant 0 : index
      %c0_13 = arith.constant 0 : index
      %18 = vector.load %arg4[%c0_12, %c0_13] : memref<1x1xf32, #tpu.memory_space<vmem>>, vector<1x1xf32>
      %19 = vector.broadcast %18 : vector<1x1xf32> to vector<2x1xf32>
      %20 = arith.subf %17, %19 : vector<2x1xf32>
      %c0_14 = arith.constant 0 : index
      %c0_15 = arith.constant 0 : index
      %21 = vector.load %arg5[%c0_14, %c0_15] : memref<2x1xf32, #tpu.memory_space<vmem>>, vector<2x1xf32>
      tpu.vector_store %arg5[%c0_14, %c0_15], %20 {strides = array<i32>} : memref<2x1xf32, #tpu.memory_space<vmem>>, vector<2x1xf32>,
    } else {
    }
    return
  }
  func.func @transform_0(%arg0: i32, %arg1: i32) -> (i32, i32) {
    %c0_i32 = arith.constant 0 : i32
    return %arg0, %arg1 : i32, i32
  }
  func.func @transform_1(%arg0: i32, %arg1: i32) -> (i32, i32) {
    %c0_i32 = arith.constant 0 : i32
    %c0_i32_0 = arith.constant 0 : i32
    return %c0_i32, %arg1 : i32, i32
  }
  func.func @transform_2(%arg0: i32, %arg1: i32) -> (i32, i32) {
    %c0_i32 = arith.constant 0 : i32
    %c0_i32_0 = arith.constant 0 : i32
    %c0_i32_1 = arith.constant 0 : i32
    return %c0_i32, %c0_i32_0 : i32, i32
  }
  func.func @transform_3(%arg0: i32, %arg1: i32) -> (i32, i32) {
    %c0_i32 = arith.constant 0 : i32
    %c0_i32_0 = arith.constant 0 : i32
    return %arg0, %c0_i32 : i32, i32
  }
}

</mosaic_0001>

<bundles_post_ra>
// kernel: tpu_custom_call.1
= control target key start
LH: loop header
LB: loop body
LE: loop exit
PB: predicated region body
PF: predicated region fallthrough
CT: control target
= control target key end

     0   :  { %s281_s0 = inlined_call_operand.hbm [shape: bf16[2,768], index: 0, kind: input, shape index: {}]   ;;  %s282_s1 = inlined_call_operand.vmem [shape: bf16[1,768], index: 1, kind: input, shape index: {}]   ;;  %s283_s2 = inlined_call_operand.<no memory space> [shape: f32[1,1], index: 2, kind: input, shape index: {}]   ;;  %s284_s3 = inlined_call_operand.vmem [shape: f32[2,1], index: 3, kind: output, shape index: {}]  }
   0x1   :  { %v8_v0 = vstv %s283_s2 }
   0x2   :  { %9 = vst [vmem:[#allocation3] sm:$0x1] %v8_v0 }
   0x3   :  { %10 = vsyncpa [#allocation5], 0  ;;  %s228_s14 = smov [#allocation4]   ;;  %s204_s18 = scalar_lea.hbm %s281_s0, 96 }
   0x4   :  { %s17_s15 = sshll.u32 %s228_s14, 4  ;;  %p205_p0 = scmp.ne.s32.totalorder %s281_s0, %s204_s18  ;;  %s18_s15 = int_to_ptr.vmem [resolvable:$true] %s17_s15 }
   0x5   :  { %p208_p1 = scmp.lt.u32.totalorder %s204_s18, %s281_s0 }
   0x7   :  { %p210_p2 = pnand %p208_p1, %p205_p0 }
   0x9   :  { %213 = shalt.err (!%p210_p2)
}
   0xa   :  { %s214_s2 = scalar_lea.vmem %s18_s15, 96  ;;  %p219_p4 = scmp.lt.s32.totalorder %s18_s15, %s18_s15 }
   0xb   :  { %p215_p3 = scmp.ne.s32.totalorder %s18_s15, %s214_s2  ;;  %p220_p5 = scmp.lt.s32.totalorder %s214_s2, %s214_s2 }
   0xd   :  { %p221_p6 = por %p220_p5, %p219_p4 }
   0xf   :  { %p222_p7 = pnand %p221_p6, %p215_p3 }
  0x11   :  { %225 = shalt.err (!%p222_p7)
}
  0x12   :  { %20 = dma.hbm_to_vmem [thread:$0]  %s281_s0, 96, %s18_s15, [#allocation5]  }
  0x13   :  { %226 = dma.done.wait [#allocation5], 96  }
  0x14   :  { %227 = vsyncadd [#allocation5], 4294967200  ;;  %v43_v1 = vlaneseq  ;;  %vm32_vm0 = vcmask 1024   ;;  %v229_v3 = vmov 0.0   ;;  %v230_v4 = vmov 1983009808  }
  0x15   :  { %33 = vst.msk [vmem:[#allocation2] sm:$0x3] %vm32_vm0, %v229_v3  ;;  %v106_v5 = vunpack.c.l.s4 %v230_v4  ;;  %v37_v10 = vld [vmem:[%s282_s1] sm:$0x3f]  ;;  %vm165_vm1 = vcmask 1041408  }
  0x16   :  { %v44_v2 = vshrl.u32 %v43_v1, 7  ;;  %v38_v12 = vunpack.c.l.bf16 %v37_v10  ;;  %v39_v13 = vunpack.c.h.bf16 %v37_v10  ;;  %v34_v25 = vld [vmem:[#allocation4] sm:$0x3f]  ;;  %v200_v60 = vld [vmem:[#allocation3] ss:$0 sm:$0xff] }
  0x17   :  { %v107_v11 = vunpack.c.0.s8 %v106_v5  ;;  %v35_v31 = vunpack.c.l.bf16 %v34_v25  ;;  %v36_v32 = vunpack.c.h.bf16 %v34_v25 }
  0x18   :  { %v45_v6 = vsub.s32 0, %v44_v2  ;;  %v49_v7 = vsub.s32 2, %v44_v2  ;;  %v53_v8 = vsub.s32 4, %v44_v2  ;;  %v57_v9 = vsub.s32 6, %v44_v2 }
  0x19   :  { %v110_v20 = vsub.s32 %v107_v11, %v44_v2 }
  0x1a   :  { %v46_v14 = vrot.slane %v38_v12, %v45_v6  ;;  %v50_v15 = vrot.slane %v38_v12, %v49_v7  ;;  %v54_v16 = vrot.slane %v38_v12, %v53_v8  ;;  %v58_v17 = vrot.slane %v38_v12, %v57_v9 }
  0x1b   :  { %v62_v18 = vrot.slane %v39_v13, %v45_v6  ;;  %v66_v19 = vrot.slane %v39_v13, %v49_v7 }
  0x1c   :  { %v76_v21 = vrot.slane %v46_v14, %v45_v6  ;;  %v80_v22 = vrot.slane %v50_v15, %v45_v6  ;;  %v84_v23 = vrot.slane %v54_v16, %v45_v6  ;;  %v88_v24 = vrot.slane %v58_v17, %v45_v6  ;;  %v40_v57 = vld [vmem:[#allocation2] sm:$0x3] }
  0x1d   :  { %v92_v26 = vrot.slane %v62_v18, %v45_v6  ;;  %v96_v27 = vrot.slane %v66_v19, %v45_v6 }
  0x1e   :  { %v103_v28 = vcombine.low %v76_v21, %v80_v22  ;;  %v104_v29 = vcombine.low %v84_v23, %v88_v24 }
  0x1f   :  { %v120_v30 = vcombine.low %v92_v26, %v96_v27 }
  0x20   :  { %v111_v33 = vrot.slane %v103_v28, %v110_v20  ;;  %v118_v34 = vrot.slane %v104_v29, %v110_v20 }
  0x21   :  { %v127_v35 = vrot.slane %v120_v30, %v110_v20 }
  0x22   :  { %v119_v36 = vcombine.low %v111_v33, %v118_v34 }
  0x23   :  { %v131_v38 = vmul.f32 %v127_v35, %v36_v32 }
  0x24   :  { %v130_v37 = vmul.f32 %v119_v36, %v35_v31 }
  0x25   :  { %v157_v43 = vrot.slane %v131_v38, %v110_v20 }
  0x26   :  { %v134_v39 = vcombine.high %v130_v37, %v130_v37  ;;  %v141_v40 = vrot.slane %v130_v37, %v110_v20 }
  0x27   :  { %v158_v49 = vcombine.high %v157_v43, %v157_v43  ;;  %v173_v52 = vsel %vm165_vm1, %v157_v43, 0.0 }
  0x28   :  { %v148_v41 = vrot.slane %v134_v39, %v110_v20  ;;  %v149_v42 = vcombine.high %v141_v40, %v141_v40  ;;  %v166_v44 = vsel %vm165_vm1, %v141_v40, 0.0 }
  0x29   :  { %v175_v54 = vsel %vm165_vm1, %v158_v49, 0.0 }
  0x2a   :  { %v150_v45 = vcombine.high %v148_v41, %v148_v41  ;;  %v167_v46 = vsel %vm165_vm1, %v149_v42, 0.0  ;;  %v169_v47 = vsel %vm165_vm1, %v148_v41, 0.0 }
  0x2b   :  { %v168_v48 = vadd.f32 %v167_v46, %v166_v44 }
  0x2c   :  { %v171_v50 = vsel %vm165_vm1, %v150_v45, 0.0 }
  0x2d   :  { %v170_v51 = vadd.f32 %v169_v47, %v168_v48 }
  0x2f   :  { %v172_v53 = vadd.f32 %v171_v50, %v170_v51 }
  0x31   :  { %v174_v55 = vadd.f32 %v173_v52, %v172_v53 }
  0x33   :  { %v176_v56 = vadd.f32 %v175_v54, %v174_v55 }
  0x35   :  { %177 = vadd.xlane.f32.xlu0 %v176_v56 }
  0xc2   :  { %v178_v58 = vpop.xlane.xlu0 %177 }
  0xc3   :  { %v179_v59 = vadd.f32 %v178_v58, %v40_v57 }
  0xc5   :  { %181 = vst.msk [vmem:[#allocation2] sm:$0x3] %vm32_vm0, %v179_v59 }
  0xcc   :  { %v185_v61 = vld [vmem:[#allocation2] sm:$0x3] }
  0xcd   :  { %v193_v62 = vsub.f32 %v185_v61, %v200_v60 }
  0xcf   :  { %194 = vst.msk [vmem:[%s284_s3] sm:$0x3] %vm32_vm0, %v193_v62 }
  0xd0   :  { %199 = vsyncpa [#allocation5], 1 }

</bundles_post_ra>
